<compile_context>
chip_gen: v6e
topology: v6e:2x2x1
jax: 0.10.0
libtpu: 0.0.40
codegen_flags: <defaults>
</compile_context>

<pallas_src>
import math

import jax
import jax.numpy as jnp
from jax.experimental import pallas as pl
from jax.experimental.pallas import tpu as pltpu


# ---------------------------------------------------------------------------
# pltpu.roll convention probe
# ---------------------------------------------------------------------------
# pltpu.roll is documented to match np.roll (out[k] = in[(k - shift) % n]); we
# probe once on-device so a convention change can never silently mirror the
# 3x3 stencil.
_ROLL_MATCHES_NUMPY = None


def _roll_matches_numpy():
    global _ROLL_MATCHES_NUMPY
    if _ROLL_MATCHES_NUMPY is None:
        def probe(x_ref, o_ref):
            o_ref[...] = pltpu.roll(x_ref[...], 1, 1)

        x = jnp.tile(jnp.arange(128, dtype=jnp.float32)[None, :], (8, 1))
        y = pl.pallas_call(
            probe, out_shape=jax.ShapeDtypeStruct((8, 128), jnp.float32))(x)
        _ROLL_MATCHES_NUMPY = bool(float(y[0, 0]) == 127.0)
    return _ROLL_MATCHES_NUMPY


def _roll_shift_amounts(h, w):
    """Positive roll amounts giving (value@k-1, value@k+1, value@k-W, value@k+W)."""
    hw = h * w
    if _roll_matches_numpy():
        return 1, hw - 1, w, hw - w
    return hw - 1, 1, hw - w, w


# ---------------------------------------------------------------------------
# Kernel factory: fused 3x3 reflect-pad conv + bias + PReLU (+ BN statistics)
# ---------------------------------------------------------------------------
def _make_conv_kernel(h, w, cin, shifts, with_stats):
    hw = h * w
    s_prev_col, s_next_col, s_prev_row, s_next_row = shifts
    inv_hw = 1.0 / float(hw)

    def _col_in_row(lane):
        if w & (w - 1) == 0:                      # power-of-two fast path (bit ops)
            return lane & (w - 1)
        # TODO(synk): non-power-of-two W falls back to vector integer remainder.
        return lane % w

    def _taps(x):
        """Nine reflect-padded 3x3 taps of x (C, H*W); order t = kh*3 + kw."""
        lane = jax.lax.broadcasted_iota(jnp.int32, (1, hw), 1)
        cid = _col_in_row(lane)
        first_col = cid == 0
        last_col = cid == (w - 1)
        first_row = lane < w
        last_row = lane >= (hw - w)

        up = pltpu.roll(x, s_prev_row, 1)         # value at (i-1, j), valid i >= 1
        dn = pltpu.roll(x, s_next_row, 1)         # value at (i+1, j), valid i <= H-2
        rows = (jnp.where(first_row, dn, up),     # kh=0: reflected row i-1
                x,                                # kh=1
                jnp.where(last_row, up, dn))      # kh=2: reflected row i+1

        taps = []
        for r in rows:
            lf = pltpu.roll(r, s_prev_col, 1)     # (i, j-1), valid j >= 1
            rt = pltpu.roll(r, s_next_col, 1)     # (i, j+1), valid j <= W-2
            taps.append(jnp.where(first_col, rt, lf))   # kw=0: reflected col j-1
            taps.append(r)                              # kw=1
            taps.append(jnp.where(last_col, lf, rt))    # kw=2: reflected col j+1
        return taps

    def kernel(x_ref, w_ref, b_ref, alpha_ref, *out_and_scratch):
        if with_stats:
            o_ref, mean_ref, m2_ref, col_ref = out_and_scratch
        else:
            o_ref, col_ref = out_and_scratch

        x = x_ref[0].astype(jnp.float32)                      # (Cin, H*W)

        # Pack the nine taps into the VMEM im2col scratch -> one K=9*Cin matmul.
        for t, patch in enumerate(_taps(x)):
            col_ref[t * cin:(t + 1) * cin, :] = patch

        y = jnp.dot(w_ref[...], col_ref[...].astype(jnp.bfloat16),
                    preferred_element_type=jnp.float32)       # (Cout, H*W), lane-dense
        y = y + b_ref[...]                                    # (Cout, 1) broadcast
        alpha = alpha_ref[0]
        y = jnp.where(y >= 0.0, y, alpha * y)                 # PReLU

        if with_stats:
            yb = y.astype(o_ref.dtype)
            o_ref[...] = yb[None]
            # Per-image, per-channel spatial mean and centered sum-of-squares of
            # exactly the tensor conv2 will consume (bf16-rounded).
            yf = yb.astype(jnp.float32)
            mean = jnp.sum(yf, axis=1, keepdims=True) * inv_hw       # (Cout, 1)
            mean_ref[...] = mean[None]
            m2_ref[...] = jnp.sum((yf - mean) ** 2, axis=1, keepdims=True)[None]
        else:
            o_ref[...] = y[None].astype(o_ref.dtype)

    return kernel


# ---------------------------------------------------------------------------
# Wrapper
# ---------------------------------------------------------------------------
def conv3x3_reflect_prelu(x_flat, w_oihw, bias, alpha, h, w, *,
                          out_dtype=jnp.float32, with_stats=False):
    """3x3 stride-1 reflect-padded conv + bias + PReLU.

    x_flat : (N, Cin, H*W)  channels-major, spatial flattened (lane axis)
    w_oihw : (Cout, Cin, 3, 3)  PyTorch layout
    Returns (N, Cout, H*W)[, per-image mean (N,Cout,1), per-image M2 (N,Cout,1)].
    """
    n, cin, hw = x_flat.shape
    assert hw == h * w
    cout = w_oihw.shape[0]

    # (Cout, Cin, 3, 3) -> (Cout, 9*Cin); row index = (kh*3 + kw)*Cin + ci.
    w_mat = jnp.transpose(w_oihw, (0, 2, 3, 1)).reshape(cout, 9 * cin)
    w_mat = w_mat.astype(jnp.bfloat16)
    b_col = bias.reshape(cout, 1).astype(jnp.float32)
    alpha_arr = jnp.asarray(alpha, jnp.float32).reshape(1)

    kernel = _make_conv_kernel(h, w, cin, _roll_shift_amounts(h, w), with_stats)

    in_specs = [
        pl.BlockSpec((1, cin, hw), lambda i: (i, 0, 0)),    # one image per grid step
        pl.BlockSpec((cout, 9 * cin), lambda i: (0, 0)),    # weights stay resident
        pl.BlockSpec((cout, 1), lambda i: (0, 0)),          # bias
        pl.BlockSpec(memory_space=pltpu.MemorySpace.SMEM),  # PReLU slope (scalar)
    ]
    out_blk = pl.BlockSpec((1, cout, hw), lambda i: (i, 0, 0))
    if with_stats:
        out_shape = (jax.ShapeDtypeStruct((n, cout, hw), out_dtype),
                     jax.ShapeDtypeStruct((n, cout, 1), jnp.float32),
                     jax.ShapeDtypeStruct((n, cout, 1), jnp.float32))
        out_specs = (out_blk,
                     pl.BlockSpec((1, cout, 1), lambda i: (i, 0, 0)),
                     pl.BlockSpec((1, cout, 1), lambda i: (i, 0, 0)))
    else:
        out_shape = jax.ShapeDtypeStruct((n, cout, hw), out_dtype)
        out_specs = out_blk

    # VMEM budget: double-buffered in/out blocks + im2col scratch + headroom.
    in_bytes = (cin * hw * jnp.dtype(x_flat.dtype).itemsize
                + cout * 9 * cin * 2 + cout * 4 + 4)
    out_bytes = cout * hw * jnp.dtype(out_dtype).itemsize
    stats_bytes = (2 * cout * 4) if with_stats else 0
    est = 2 * (in_bytes + out_bytes + stats_bytes) + 9 * cin * hw * 4 + (2 << 20)
    vmem_limit = int(min(64 * 1024 * 1024, max(16 * 1024 * 1024, 2 * est)))

    return pl.pallas_call(
        kernel,
        out_shape=out_shape,
        grid_spec=pltpu.PrefetchScalarGridSpec(
            num_scalar_prefetch=0,
            grid=(n,),
            in_specs=in_specs,
            out_specs=out_specs,
            scratch_shapes=[pltpu.VMEM((9 * cin, hw), jnp.float32)]),
        compiler_params=pltpu.CompilerParams(
            dimension_semantics=("parallel",),   # per-image stats -> no accumulation
            vmem_limit_bytes=vmem_limit),
    )(x_flat, w_mat, b_col, alpha_arr)


# ---------------------------------------------------------------------------
# Block forward (matches the torch module's semantics, training-mode BN)
# ---------------------------------------------------------------------------
def block_forward(x_nchw, params, eps=1e-5):
    n, cin, h, w = x_nchw.shape
    cout = params["w1"].shape[0]
    hw = h * w

    x_flat = x_nchw.reshape(n, cin, hw)          # free reshape, already lane-friendly

    # conv1 + PReLU with fused per-image per-channel mean / centered SSQ.
    y1, mean_i, m2_i = conv3x3_reflect_prelu(
        x_flat, params["w1"], params["b1"], params["a1"], h, w,
        out_dtype=jnp.bfloat16, with_stats=True)

    # BatchNorm2d batch statistics (biased variance), combined from per-image
    # moments (stable parallel-variance combine; no E[x^2]-E[x]^2 cancellation).
    mean_i = mean_i[:, :, 0]                     # (N, C)
    m2_i = m2_i[:, :, 0]                         # (N, C)
    mean = jnp.mean(mean_i, axis=0)              # (C,)
    var = (jnp.sum(m2_i, axis=0)
           + hw * jnp.sum((mean_i - mean[None, :]) ** 2, axis=0)) / (n * hw)
    scale = params["gamma"] * jax.lax.rsqrt(var + eps)
    shift = params["beta"] - mean * scale

    # Fold BN into conv2 (exact: a per-channel affine commutes with reflect pad).
    w2f = params["w2"] * scale[None, :, None, None]
    b2f = params["b2"] + jnp.sum(params["w2"] * shift[None, :, None, None],
                                 axis=(1, 2, 3))

    y2 = conv3x3_reflect_prelu(y1, w2f, b2f, params["a2"], h, w,
                               out_dtype=jnp.float32, with_stats=False)
    return y2.reshape(n, cout, h, w)             # already NCHW, no transpose needed


# ---------------------------------------------------------------------------
# Deterministic parameter init (shapes / defaults follow the torch module)
# ---------------------------------------------------------------------------
def init_block_params(key, in_ch, out_ch):
    def conv_init(k, co, ci, ksz):
        bound = 1.0 / math.sqrt(ci * ksz * ksz)
        kw, kb = jax.random.split(k)
        wgt = jax.random.uniform(kw, (co, ci, ksz, ksz), jnp.float32, -bound, bound)
        b = jax.random.uniform(kb, (co,), jnp.float32, -bound, bound)
        return wgt, b

    k1, k2 = jax.random.split(key)
    w1, b1 = conv_init(k1, out_ch, in_ch, 3)
    w2, b2 = conv_init(k2, out_ch, out_ch, 3)
    return dict(
        w1=w1, b1=b1, a1=jnp.float32(0.25),          # nn.PReLU() default slope
        gamma=jnp.ones((out_ch,), jnp.float32),      # BatchNorm2d affine params
        beta=jnp.zeros((out_ch,), jnp.float32),
        w2=w2, b2=b2, a2=jnp.float32(0.25),
    )


# ---------------------------------------------------------------------------
# Pure-JAX reference (PyTorch semantics, f32) for a sanity parity check
# ---------------------------------------------------------------------------
def _reference_block_forward(x, params, eps=1e-5):
    def conv(z, wgt, b):
        zp = jnp.pad(z, ((0, 0), (0, 0), (1, 1), (1, 1)), mode="reflect")
        out = jax.lax.conv_general_dilated(
            zp, wgt, window_strides=(1, 1), padding="VALID",
            dimension_numbers=("NCHW", "OIHW", "NCHW"),
            precision=jax.lax.Precision.HIGHEST)
        return out + b[None, :, None, None]

    def prelu(z, a):
        return jnp.where(z >= 0, z, a * z)

    y = prelu(conv(x, params["w1"], params["b1"]), params["a1"])
    mean = jnp.mean(y, axis=(0, 2, 3))
    var = jnp.mean((y - mean[None, :, None, None]) ** 2, axis=(0, 2, 3))
    yn = (y - mean[None, :, None, None]) * jax.lax.rsqrt(var + eps)[None, :, None, None]
    yn = yn * params["gamma"][None, :, None, None] + params["beta"][None, :, None, None]
    return prelu(conv(yn, params["w2"], params["b2"]), params["a2"])


# ---------------------------------------------------------------------------
if __name__ == "__main__":
    in_ch, out_ch = 4, 8
    key = jax.random.PRNGKey(0)
    kx, kp = jax.random.split(key)

    # Input like PyTorch: NCHW (batch=2, 4 channels, 16x16).
    x = jax.random.normal(kx, (2, in_ch, 16, 16), jnp.float32)
    params = init_block_params(kp, in_ch, out_ch)

    _roll_matches_numpy()                 # resolve the roll convention once

    fwd = jax.jit(block_forward)
    out = jax.block_until_ready(fwd(x, params))

    assert out.shape == (2, out_ch, 16, 16)
    assert bool(jnp.all(jnp.isfinite(out)))

    # Loose parity check vs. an f32 reference (bf16 weights / bf16 intermediate).
    ref = _reference_block_forward(x, params)
    max_ref = float(jnp.max(jnp.abs(ref)))
    err = float(jnp.max(jnp.abs(out - ref)))
    assert err <= 0.05 + 0.05 * max_ref, f"mismatch vs reference: {err} (|ref|max={max_ref})"

    print("KERNEL_OK")
</pallas_src>

<mosaic_0001>
module attributes {stable_mosaic.version = 11 : i64} {
  func.func @probe(%arg0: memref<8x128xf32, #tpu.memory_space<vmem>>, %arg1: memref<8x128xf32, #tpu.memory_space<vmem>>) attributes {dimension_semantics = [], scalar_prefetch = 0 : i64, scratch_operands = 0 : i64, tpu.core_type = #tpu.core_type<tc>} {
    %c0 = arith.constant 0 : index
    %c0_0 = arith.constant 0 : index
    %0 = vector.load %arg0[%c0, %c0_0] : memref<8x128xf32, #tpu.memory_space<vmem>>, vector<8x128xf32>
    %c1_i32 = arith.constant 1 : i32
    %1 = tpu.dynamic_rotate %0 by %c1_i32 dim 1 : vector<8x128xf32>, i32 -> vector<8x128xf32>
    %c0_1 = arith.constant 0 : index
    %c0_2 = arith.constant 0 : index
    %2 = vector.load %arg1[%c0_1, %c0_2] : memref<8x128xf32, #tpu.memory_space<vmem>>, vector<8x128xf32>
    tpu.vector_store %arg1[%c0_1, %c0_2], %1 {strides = array<i32>} : memref<8x128xf32, #tpu.memory_space<vmem>>, vector<8x128xf32>,
    return
  }
}

</mosaic_0001>

<bundles_post_ra>
// kernel: tpu_custom_call.1
= control target key start
LH: loop header
LB: loop body
LE: loop exit
PB: predicated region body
PF: predicated region fallthrough
CT: control target
= control target key end

     0   :  { %6 = vsyncpa [#allocation3], 0  ;;  %s106_s0 = inlined_call_operand.hbm [shape: f32[8,128], index: 0, kind: input, shape index: {}]   ;;  %s107_s1 = inlined_call_operand.hbm [shape: f32[8,128], index: 1, kind: output, shape index: {}]  }
   0x1   :  { %7 = vsyncpa [#allocation4], 0  ;;  %s87_s6 = smov [#allocation2]  }
   0x2   :  { %s14_s7 = sshll.u32 %s87_s6, 4  ;;  %s15_s7 = int_to_ptr.vmem [resolvable:$true] %s14_s7 }
   0x3   :  { %s51_s8 = scalar_lea.vmem %s15_s7, 128  ;;  %p56_p1 = scmp.lt.s32.totalorder %s15_s7, %s15_s7 }
   0x4   :  { %p52_p0 = scmp.ne.s32.totalorder %s15_s7, %s51_s8  ;;  %p57_p2 = scmp.lt.s32.totalorder %s51_s8, %s51_s8 }
   0x6   :  { %p58_p3 = por %p57_p2, %p56_p1 }
   0x8   :  { %p59_p4 = pnand %p58_p3, %p52_p0 }
   0xa   :  { %62 = shalt.err (!%p59_p4)
}
   0xb   :  { %17 = dma.hbm_to_vmem [thread:$0]  %s106_s0, 128, %s15_s7, [#allocation3]  }
   0xc   :  { %83 = dma.done.wait [#allocation3], 128  }
   0xd   :  { %84 = vsyncadd [#allocation3], 4294967168  ;;  %v21_v0 = vld [vmem:[#allocation2] sm:$0xff]  ;;  %s88_s11 = smov 1   ;;  %s89_s12 = smov [#allocation5]  }
   0xe   :  { %22 = vrot.lane.b32.xlu0 %v21_v0, %s88_s11  ;;  %s31_s13 = sshll.u32 %s89_s12, 4  ;;  %s32_s13 = int_to_ptr.vmem [resolvable:$true] %s31_s13 }
   0xf   :  { %s63_s14 = scalar_lea.vmem %s32_s13, 128  ;;  %p68_p6 = scmp.lt.s32.totalorder %s32_s13, %s32_s13 }
  0x10   :  { %p64_p5 = scmp.ne.s32.totalorder %s32_s13, %s63_s14  ;;  %p69_p7 = scmp.lt.s32.totalorder %s63_s14, %s63_s14 }
  0x12   :  { %p70_p8 = por %p69_p7, %p68_p6 }
  0x14   :  { %p71_p9 = pnand %p70_p8, %p64_p5 }
  0x80   :  { %v23_v1 = vpop.permute.xlu0 %22 }
  0x81   :  { %24 = vst [vmem:[#allocation5] sm:$0xff] %v23_v1 }
  0x82   :  { %74 = shalt.err (!%p71_p9)
}
  0x83   :  { %34 = dma.vmem_to_hbm [thread:$0]  %s32_s13, 128, %s107_s1, [#allocation4]  }
  0x84   :  { %85 = dma.done.wait [#allocation4], 128  }
  0x85   :  { %86 = vsyncadd [#allocation4], 4294967168 }
  0x86   :  { %38 = vsyncpa [#allocation3], 1 }
  0x87   :  { %39 = vsyncpa [#allocation4], 1 }

</bundles_post_ra>
